<compile_context>
chip_gen: v6e
topology: v6e:2x2x1
jax: 0.10.0
libtpu: 0.0.40
codegen_flags: <defaults>
</compile_context>

<pallas_src>
import jax
import jax.numpy as jnp
from jax.experimental import pallas as pl
from jax.experimental.pallas import tpu as pltpu


def _leaky_relu(x, slope=0.01):
    # torch.nn.functional.leaky_relu default negative_slope = 0.01
    return jnp.where(x > 0, x, slope * x)


def _cdiv(a, b):
    return -(-a // b)


def _round_up(n, m):
    return _cdiv(n, m) * m


def _tpu_vmem_capacity_bytes():
    try:
        cap = getattr(pltpu.get_tpu_info(), "vmem_capacity_bytes", None)
        if cap:
            return int(cap)
    except Exception:
        pass
    return 64 * 1024 * 1024  # conservative default: v7x per-TC VMEM


def _plan(n):
    """Generation-aware VMEM limit + tile sizes for the aggregation kernels."""
    cap = _tpu_vmem_capacity_bytes()
    if cap >= 128 * 1024 * 1024:          # v5e / v6e: 128 MiB VMEM
        vmem_limit = 100 * 1024 * 1024
        tm_target, tk_target = 512, 4096
    else:                                  # v7x: 64 MiB per TensorCore
        vmem_limit = 48 * 1024 * 1024
        tm_target, tk_target = 512, 2048

    n128 = _round_up(max(n, 1), 128)

    # Row tile: close to target without extra padding; split into >= 2 row
    # tiles when that is free (lets the "parallel" axis use both v7x cores).
    n_row_tiles = _cdiv(n128, tm_target)
    if n_row_tiles == 1 and n128 >= 256 and (n128 // 2) % 128 == 0:
        n_row_tiles = 2
    tm = _round_up(_cdiv(n128, n_row_tiles), 128)
    n_rows = _round_up(n, tm)

    # Column (reduction) tile: large to amortize per-step pipeline overhead,
    # sized from the actual tile count so padding stays bounded.
    n_col_tiles = _cdiv(n128, tk_target)
    tk = _round_up(_cdiv(n128, n_col_tiles), 128)
    n_cols = _round_up(n, tk)

    return vmem_limit, tm, tk, n_rows, n_cols


# ---------------------------------------------------------------------------
# Aggregation layer with fused "next" matmul:
#   OUT = leaky_relu(A_hat @ R + bias) @ W_next + b_next
# Grid = (row tiles, reduction tiles); A_hat is the only large streamed
# operand; R is either fully VMEM-resident (sliced in-kernel) or streamed.
# ---------------------------------------------------------------------------
def _make_agg_kernel(tk, rhs_resident):
    def kernel(a_ref, r_ref, b_ref, wn_ref, bn_ref, o_ref, acc_ref):
        k = pl.program_id(1)

        @pl.when(k == 0)
        def _():
            acc_ref[...] = jnp.zeros_like(acc_ref)

        if rhs_resident:
            # Full R lives in VMEM; take the k-th (tk, C) window.
            r = r_ref[pl.ds(pl.multiple_of(k * tk, tk), tk), :]
        else:
            r = r_ref[...]

        # Pure A-tile stream: (TM, TK) bf16 @ (TK, C) bf16 -> f32 accumulator.
        acc_ref[...] += jnp.dot(a_ref[...], r, preferred_element_type=jnp.float32)

        @pl.when(k == pl.num_programs(1) - 1)
        def _():
            h = _leaky_relu(acc_ref[...] + b_ref[...])        # bias + activation
            out = jnp.dot(                                    # fused next matmul
                h.astype(wn_ref.dtype), wn_ref[...],
                preferred_element_type=jnp.float32,
            ) + bn_ref[...]
            o_ref[...] = out.astype(o_ref.dtype)

    return kernel


def agg_layer(a_hat, r, bias, w_next, b_next, out_dtype, *, tm, tk, vmem_limit):
    n_rows, n_cols = a_hat.shape
    c_in = r.shape[1]
    c_out = w_next.shape[1]
    grid = (pl.cdiv(n_rows, tm), pl.cdiv(n_cols, tk))

    # Keep the whole RHS VMEM-resident (constant block index -> fetched once)
    # when it comfortably fits; otherwise stream a (tk, c_in) slice per step.
    rhs_bytes = int(n_cols) * int(c_in) * r.dtype.itemsize
    rhs_resident = (2 * rhs_bytes) <= (vmem_limit // 4)
    if rhs_resident:
        r_spec = pl.BlockSpec((n_cols, c_in), lambda i, k: (0, 0))
    else:
        r_spec = pl.BlockSpec((tk, c_in), lambda i, k: (k, 0))

    flops = 2 * n_rows * n_cols * c_in + 2 * n_rows * c_in * c_out
    bytes_accessed = (a_hat.size * a_hat.dtype.itemsize
                      + rhs_bytes
                      + n_rows * c_out * jnp.dtype(out_dtype).itemsize)

    return pl.pallas_call(
        _make_agg_kernel(tk, rhs_resident),
        out_shape=jax.ShapeDtypeStruct((n_rows, c_out), out_dtype),
        grid_spec=pltpu.PrefetchScalarGridSpec(
            num_scalar_prefetch=0,
            grid=grid,
            in_specs=[
                pl.BlockSpec((tm, tk), lambda i, k: (i, k)),       # A_hat tile
                r_spec,                                            # RHS
                pl.BlockSpec((1, c_in), lambda i, k: (0, 0)),      # layer bias
                pl.BlockSpec((c_in, c_out), lambda i, k: (0, 0)),  # fused W_next
                pl.BlockSpec((1, c_out), lambda i, k: (0, 0)),     # fused b_next
            ],
            out_specs=pl.BlockSpec((tm, c_out), lambda i, k: (i, 0)),
            scratch_shapes=[pltpu.VMEM((tm, c_in), jnp.float32)],
        ),
        compiler_params=pltpu.CompilerParams(
            dimension_semantics=("parallel", "arbitrary"),
            vmem_limit_bytes=vmem_limit,
        ),
        cost_estimate=pl.CostEstimate(
            flops=int(flops), transcendentals=0,
            bytes_accessed=int(bytes_accessed)),
    )(a_hat, r, bias, w_next, b_next)


# ---------------------------------------------------------------------------
# Plain-JAX glue: dense GCN normalization (matches PyG gcn_norm with
# add_self_loops=True, self-loop weight 1), built directly at padded shape.
# ---------------------------------------------------------------------------
def build_normalized_adjacency(edge_index, edge_weight, num_nodes,
                               n_rows=None, n_cols=None):
    n_rows = num_nodes if n_rows is None else n_rows
    n_cols = num_nodes if n_cols is None else n_cols
    row, col = edge_index[0], edge_index[1]
    loop_idx = jnp.arange(num_nodes, dtype=edge_index.dtype)
    row = jnp.concatenate([row, loop_idx])
    col = jnp.concatenate([col, loop_idx])
    w = jnp.concatenate([edge_weight, jnp.ones((num_nodes,), jnp.float32)])

    deg = jnp.zeros((num_nodes,), jnp.float32).at[col].add(w)
    deg_inv_sqrt = jnp.where(deg > 0, 1.0 / jnp.sqrt(deg), 0.0)
    norm_w = deg_inv_sqrt[row] * w * deg_inv_sqrt[col]

    # Aggregation into the target node (col): out[dst] += norm * x[src].
    a_hat = jnp.zeros((n_rows, n_cols), jnp.float32).at[col, row].add(norm_w)
    return a_hat


# ---------------------------------------------------------------------------
# Full GCN forward: conv1 -> leaky_relu -> conv2 -> leaky_relu -> fc1.
# ---------------------------------------------------------------------------
def gcn_forward(edge_index, edge_weight, x, w1, b1, w2, b2, wf, bfc):
    n = x.shape[0]
    c1 = w1.shape[1]
    c2 = w2.shape[1]
    bf16 = jnp.bfloat16

    vmem_limit, tm, tk, n_rows, n_cols = _plan(n)

    # Adjacency built directly at the padded (row-tile, col-tile) shape.
    a_p = build_normalized_adjacency(
        edge_index, edge_weight, n, n_rows, n_cols).astype(bf16)

    # Hoisted tiny dense matmul XW1: (N, 8) @ (8, 32) -- plain XLA dot.
    xw1 = jnp.dot(x, w1, preferred_element_type=jnp.float32).astype(bf16)
    r1 = jnp.zeros((n_cols, c1), bf16).at[:n, :].set(xw1)

    # Layer 1 (+ fused layer-2 feature matmul); dropout == identity:
    #   HW2 = leaky_relu(A_hat @ XW1 + b1) @ W2
    zero_b = jnp.zeros((1, c2), jnp.float32)
    hw2 = agg_layer(a_p, r1, b1.astype(jnp.float32), w2.astype(bf16), zero_b,
                    bf16, tm=tm, tk=tk, vmem_limit=vmem_limit)

    # Layer-2 RHS must have n_cols rows (rows >= n align with zero A columns).
    if n_cols <= n_rows:
        r2 = hw2[:n_cols]
    else:
        r2 = jnp.zeros((n_cols, c2), bf16).at[:n_rows, :].set(hw2)

    # fc1 weight/bias padded to a lane-dense 128-wide slab (column 0 = output).
    wf_pad = jnp.zeros((wf.shape[0], 128), bf16).at[:, :1].set(wf.astype(bf16))
    bf_pad = jnp.zeros((1, 128), jnp.float32).at[:, :1].set(
        bfc.astype(jnp.float32))

    # Layer 2 (+ fused fc1):
    #   OUT = leaky_relu(A_hat @ HW2 + b2) @ Wf_pad + bf_pad
    out_slab = agg_layer(a_p, r2, b2.astype(jnp.float32), wf_pad, bf_pad,
                         jnp.float32, tm=tm, tk=tk, vmem_limit=vmem_limit)

    return out_slab[:n, :1]


if __name__ == "__main__":
    key = jax.random.PRNGKey(0)
    num_nodes = 256
    node_features = 8
    num_edges = 512

    keys = jax.random.split(key, 10)

    # Deterministic synthetic graph: random directed edges + their reverses.
    src = jax.random.randint(keys[0], (num_edges,), 0, num_nodes, dtype=jnp.int32)
    dst = jax.random.randint(keys[1], (num_edges,), 0, num_nodes, dtype=jnp.int32)
    edge_index = jnp.stack(
        [jnp.concatenate([src, dst]), jnp.concatenate([dst, src])], axis=0)
    edge_weight = jnp.abs(
        jax.random.normal(keys[2], (2 * num_edges,), jnp.float32)) + 0.1

    # Node features.
    x = jax.random.normal(keys[3], (num_nodes, node_features), jnp.float32)

    # Parameters (Glorot-ish deterministic init).
    def glorot(k, shape):
        fan_in, fan_out = shape[0], shape[1]
        lim = jnp.sqrt(6.0 / (fan_in + fan_out))
        return jax.random.uniform(k, shape, jnp.float32, -lim, lim)

    w1 = glorot(keys[4], (node_features, 32))          # conv1.lin.weight^T
    b1 = jnp.zeros((1, 32), jnp.float32)               # conv1.bias
    w2 = glorot(keys[5], (32, 16))                     # conv2.lin.weight^T
    b2 = jnp.zeros((1, 16), jnp.float32)               # conv2.bias
    wf = glorot(keys[6], (16, 1))                      # fc1.weight^T
    bfc = jax.random.uniform(keys[7], (1, 1), jnp.float32,
                             -1.0 / jnp.sqrt(16.0), 1.0 / jnp.sqrt(16.0))

    out = gcn_forward(edge_index, edge_weight, x, w1, b1, w2, b2, wf, bfc)
    jax.block_until_ready(out)

    # Reference: same math in plain JAX, mirroring the kernel's bf16 streams
    # with f32 accumulation.
    bf16 = jnp.bfloat16
    a_hat = build_normalized_adjacency(edge_index, edge_weight, num_nodes)
    a_bf = a_hat.astype(bf16)
    xw1_r = jnp.dot(x, w1, preferred_element_type=jnp.float32).astype(bf16)
    h1_r = _leaky_relu(
        jnp.dot(a_bf, xw1_r, preferred_element_type=jnp.float32) + b1)
    hw2_r = jnp.dot(h1_r.astype(bf16), w2.astype(bf16),
                    preferred_element_type=jnp.float32).astype(bf16)
    h2_r = _leaky_relu(
        jnp.dot(a_bf, hw2_r, preferred_element_type=jnp.float32) + b2)
    ref = jnp.dot(h2_r.astype(bf16), wf.astype(bf16),
                  preferred_element_type=jnp.float32) + bfc

    assert out.shape == (num_nodes, 1)
    assert jnp.allclose(out, ref, atol=1e-2, rtol=1e-2)

    print("KERNEL_OK")
</pallas_src>

<mosaic_0001>
module attributes {stable_mosaic.version = 11 : i64} {
  func.func @kernel(%arg0: i32, %arg1: i32, %arg2: memref<128x256xbf16, #tpu.memory_space<vmem>>, %arg3: memref<256x32xbf16, #tpu.memory_space<vmem>>, %arg4: memref<1x32xf32, #tpu.memory_space<vmem>>, %arg5: memref<32x16xbf16, #tpu.memory_space<vmem>>, %arg6: memref<1x16xf32, #tpu.memory_space<vmem>>, %arg7: memref<128x16xbf16, #tpu.memory_space<vmem>>, %arg8: memref<128x32xf32, #tpu.memory_space<vmem>>) attributes {dimension_semantics = [#tpu.dimension_semantics<parallel>, #tpu.dimension_semantics<arbitrary>], iteration_bounds = array<i64: 2, 1>, scalar_prefetch = 0 : i64, scratch_operands = 1 : i64, tpu.core_type = #tpu.core_type<tc>, window_params = [{transform_indices = @transform_0, window_bounds = array<i64: 128, 256>}, {pipeline_mode = #tpu.pipeline_mode<synchronous>, transform_indices = @transform_1, window_bounds = array<i64: 256, 32>}, {pipeline_mode = #tpu.pipeline_mode<synchronous>, transform_indices = @transform_2, window_bounds = array<i64: 1, 32>}, {pipeline_mode = #tpu.pipeline_mode<synchronous>, transform_indices = @transform_3, window_bounds = array<i64: 32, 16>}, {pipeline_mode = #tpu.pipeline_mode<synchronous>, transform_indices = @transform_4, window_bounds = array<i64: 1, 16>}, {transform_indices = @transform_5, window_bounds = array<i64: 128, 16>}]} {
    %c0_i32 = arith.constant 0 : i32
    %0 = arith.cmpi eq, %arg1, %c0_i32 : i32
    %1 = arith.extui %0 : i1 to i32
    %c0_i32_0 = arith.constant 0 : i32
    %2 = arith.cmpi ne, %1, %c0_i32_0 : i32
    scf.if %2 {
      %cst_9 = arith.constant 0.000000e+00 : f32
      %15 = vector.broadcast %cst_9 : f32 to vector<128x32xf32>
      %c0_10 = arith.constant 0 : index
      %c0_11 = arith.constant 0 : index
      %16 = vector.load %arg8[%c0_10, %c0_11] : memref<128x32xf32, #tpu.memory_space<vmem>>, vector<128x32xf32>
      tpu.vector_store %arg8[%c0_10, %c0_11], %15 {strides = array<i32>} : memref<128x32xf32, #tpu.memory_space<vmem>>, vector<128x32xf32>,
    } else {
    }
    %c256_i32 = arith.constant 256 : i32
    %3 = arith.muli %arg1, %c256_i32 : i32
    %4 = tpu.assume_multiple %3, 256 : i32
    %5 = arith.index_cast %4 : i32 to index
    %c0 = arith.constant 0 : index
    %6 = vector.load %arg3[%5, %c0] : memref<256x32xbf16, #tpu.memory_space<vmem>>, vector<256x32xbf16>
    %c0_1 = arith.constant 0 : index
    %c0_2 = arith.constant 0 : index
    %7 = vector.load %arg8[%c0_1, %c0_2] : memref<128x32xf32, #tpu.memory_space<vmem>>, vector<128x32xf32>
    %c0_3 = arith.constant 0 : index
    %c0_4 = arith.constant 0 : index
    %8 = vector.load %arg2[%c0_3, %c0_4] : memref<128x256xbf16, #tpu.memory_space<vmem>>, vector<128x256xbf16>
    %cst = arith.constant dense<0.000000e+00> : vector<128x32xf32>
    %9 = tpu.matmul %8, %6, %cst {dimension_numbers = #tpu.dot_dimension_numbers<[1], [0], [0], [1], [0, 0, 1, 1], [], []>} : vector<128x256xbf16>, vector<256x32xbf16>, vector<128x32xf32> -> vector<128x32xf32>
    %10 = arith.addf %7, %9 : vector<128x32xf32>
    %c0_5 = arith.constant 0 : index
    %c0_6 = arith.constant 0 : index
    %11 = vector.load %arg8[%c0_5, %c0_6] : memref<128x32xf32, #tpu.memory_space<vmem>>, vector<128x32xf32>
    tpu.vector_store %arg8[%c0_5, %c0_6], %10 {strides = array<i32>} : memref<128x32xf32, #tpu.memory_space<vmem>>, vector<128x32xf32>,
    %c0_i32_7 = arith.constant 0 : i32
    %12 = arith.cmpi eq, %arg1, %c0_i32_7 : i32
    %13 = arith.extui %12 : i1 to i32
    %c0_i32_8 = arith.constant 0 : i32
    %14 = arith.cmpi ne, %13, %c0_i32_8 : i32
    scf.if %14 {
      %c0_9 = arith.constant 0 : index
      %c0_10 = arith.constant 0 : index
      %15 = vector.load %arg8[%c0_9, %c0_10] : memref<128x32xf32, #tpu.memory_space<vmem>>, vector<128x32xf32>
      %c0_11 = arith.constant 0 : index
      %c0_12 = arith.constant 0 : index
      %16 = vector.load %arg4[%c0_11, %c0_12] : memref<1x32xf32, #tpu.memory_space<vmem>>, vector<1x32xf32>
      %17 = vector.broadcast %16 : vector<1x32xf32> to vector<128x32xf32>
      %18 = arith.addf %15, %17 : vector<128x32xf32>
      %cst_13 = arith.constant 0.000000e+00 : f32
      %19 = vector.broadcast %cst_13 : f32 to vector<128x32xf32>
      %20 = arith.cmpf ogt, %18, %19 : vector<128x32xf32>
      %cst_14 = arith.constant 0.00999999977 : f32
      %21 = vector.broadcast %cst_14 : f32 to vector<128x32xf32>
      %22 = arith.mulf %21, %18 : vector<128x32xf32>
      %23 = arith.select %20, %18, %22 : vector<128x32xi1>, vector<128x32xf32>
      %24 = arith.truncf %23 : vector<128x32xf32> to vector<128x32xbf16>
      %c0_15 = arith.constant 0 : index
      %c0_16 = arith.constant 0 : index
      %25 = vector.load %arg5[%c0_15, %c0_16] : memref<32x16xbf16, #tpu.memory_space<vmem>>, vector<32x16xbf16>
      %cst_17 = arith.constant dense<0.000000e+00> : vector<128x16xf32>
      %26 = tpu.matmul %24, %25, %cst_17 {dimension_numbers = #tpu.dot_dimension_numbers<[1], [0], [0], [1], [0, 0, 1, 1], [], []>} : vector<128x32xbf16>, vector<32x16xbf16>, vector<128x16xf32> -> vector<128x16xf32>
      %c0_18 = arith.constant 0 : index
      %c0_19 = arith.constant 0 : index
      %27 = vector.load %arg6[%c0_18, %c0_19] : memref<1x16xf32, #tpu.memory_space<vmem>>, vector<1x16xf32>
      %28 = vector.broadcast %27 : vector<1x16xf32> to vector<128x16xf32>
      %29 = arith.addf %26, %28 : vector<128x16xf32>
      %30 = arith.truncf %29 : vector<128x16xf32> to vector<128x16xbf16>
      %c0_20 = arith.constant 0 : index
      %c0_21 = arith.constant 0 : index
      %31 = vector.load %arg7[%c0_20, %c0_21] : memref<128x16xbf16, #tpu.memory_space<vmem>>, vector<128x16xbf16>
      tpu.vector_store %arg7[%c0_20, %c0_21], %30 {strides = array<i32>} : memref<128x16xbf16, #tpu.memory_space<vmem>>, vector<128x16xbf16>,
    } else {
    }
    return
  }
  func.func @transform_0(%arg0: i32, %arg1: i32) -> (i32, i32) {
    %c0_i32 = arith.constant 0 : i32
    return %arg0, %arg1 : i32, i32
  }
  func.func @transform_1(%arg0: i32, %arg1: i32) -> (i32, i32) {
    %c0_i32 = arith.constant 0 : i32
    %c0_i32_0 = arith.constant 0 : i32
    %c0_i32_1 = arith.constant 0 : i32
    return %c0_i32, %c0_i32_0 : i32, i32
  }
  func.func @transform_2(%arg0: i32, %arg1: i32) -> (i32, i32) {
    %c0_i32 = arith.constant 0 : i32
    %c0_i32_0 = arith.constant 0 : i32
    %c0_i32_1 = arith.constant 0 : i32
    return %c0_i32, %c0_i32_0 : i32, i32
  }
  func.func @transform_3(%arg0: i32, %arg1: i32) -> (i32, i32) {
    %c0_i32 = arith.constant 0 : i32
    %c0_i32_0 = arith.constant 0 : i32
    %c0_i32_1 = arith.constant 0 : i32
    return %c0_i32, %c0_i32_0 : i32, i32
  }
  func.func @transform_4(%arg0: i32, %arg1: i32) -> (i32, i32) {
    %c0_i32 = arith.constant 0 : i32
    %c0_i32_0 = arith.constant 0 : i32
    %c0_i32_1 = arith.constant 0 : i32
    return %c0_i32, %c0_i32_0 : i32, i32
  }
  func.func @transform_5(%arg0: i32, %arg1: i32) -> (i32, i32) {
    %c0_i32 = arith.constant 0 : i32
    %c0_i32_0 = arith.constant 0 : i32
    return %arg0, %c0_i32 : i32, i32
  }
}

</mosaic_0001>

<bundles_post_ra>
// kernel: tpu_custom_call.1
= control target key start
LH: loop header
LB: loop body
LE: loop exit
PB: predicated region body
PF: predicated region fallthrough
CT: control target
= control target key end

     0   :  { %10 = vsyncpa [#allocation4], 0  ;;  %s1765_s0 = inlined_call_operand.hbm [shape: bf16[256,256], index: 0, kind: input, shape index: {}]   ;;  %s1766_s1 = inlined_call_operand.vmem [shape: bf16[256,32], index: 1, kind: input, shape index: {}]   ;;  %s1767_s2 = inlined_call_operand.vmem [shape: f32[1,32], index: 2, kind: input, shape index: {}]   ;;  %s1768_s3 = inlined_call_operand.vmem [shape: bf16[32,16], index: 3, kind: input, shape index: {}]   ;;  %s1769_s4 = inlined_call_operand.vmem [shape: f32[1,16], index: 4, kind: input, shape index: {}]   ;;  %s1770_s5 = inlined_call_operand.vmem [shape: bf16[256,16], index: 5, kind: output, shape index: {}]  }
   0x1   :  { %12 = vsyncpa [#allocation4 + $0x1], 0  ;;  %s1482_s18 = smov 0   ;;  %s1484_s19 = smov 0  }
   0x2   :  { %s1486_s20 = smov 0   ;;  %s1488_s21 = smov 0  }
   0x3   :  { %s1490_s22 = smov 0   ;;  %s1492_s23 = smov 0  }
   0x4 LB: > { %s1066_s24 = sadd.s32 4294967295, %s1446_s23   ;;  %s30_s25 = sadd.s32 1, %s1442_s22  ;;  %s1446_s23 = sphi %s1492_s23, %s18_s23   ;;  %s1442_s22 = sphi %s1490_s22, %s1778_s22   ;;  %s1438_s21 = sphi %s1488_s21, %s1777_s21   ;;  %s1434_s20 = sphi %s1486_s20, %s1776_s20   ;;  %s1430_s19 = sphi %s1484_s19, %s1775_s19   ;;  %s1426_s18 = sphi %s1482_s18, %s1774_s18  }
   0x5   : > { %p32_p0 = scmp.ge.s32.totalorder %s30_s25, 2  ;;  %s39_s26 = sadd.s32 1, %s1434_s20 }
   0x6   : > { %p46_p1 = scmp.ne.s32.totalorder %s1434_s20, %s1430_s19  ;;  %p47_p2 = scmp.eq.s32.totalorder %s1446_s23, 0 }
   0x7   : > { %s1780_s25 = smov (%p32_p0, %s30_s25), 0  ;;  %p52_p4 = scmp.ne.s32.totalorder %s1430_s19, %s1426_s18 }
   0x8   : > { %p1518_p3 = por %p47_p2, %p46_p1  ;;  %s34_s28 = ssub.s32 %s1442_s22, %s1780_s25 }
   0x9   : > { %p53_p5 = scmp.eq.s32.totalorder %s1066_s24, 0  ;;  %p37_p6 = scmp.eq.s32.totalorder %s34_s28, 0 }
   0xa   : > { %p1274_p8 = scmp.lt.s32.totalorder %s1446_s23, 2  ;;  %s198_s6 = sand.u32 1, %s1434_s20  }
   0xb   : > { %p1525_p7 = por %p53_p5, %p52_p4  ;;  %s1141_s7 = sshll.u32 %s1442_s22, 11 }
   0xc   : > { %s1531_s30 = scalar_select %p37_p6, %s1434_s20, %s39_s26  }
   0xd   : > { %s1070_s8 = sshll.u32 %s198_s6, 7  ;;  %s211_s11 = scalar_lea.hbm %s1765_s0, %s1141_s7 }
   0xe   : > { %s202_s12 = scalar_lea.vmem [#allocation3], %s1070_s8  ;;  %p1540_p9 = pnand %p1274_p8, %p1518_p3 }
   0xf   : > { %s212_s13 = sshll.u32 %s202_s12, 4  ;;  %s199_s15 = scalar_lea.sflag [#allocation4], %s198_s6  ;;  %s213_s13 = int_to_ptr.vmem [resolvable:$true] %s212_s13 }
  0x10   : > { %p1370_p10 = pneg %p1540_p9  ;;  %s1381_s16 = scalar_lea.vmem %s213_s13, 2048 }
  0x11   : > { %p1382_p11 = scmp.ne.s32.totalorder %s213_s13, %s1381_s16  ;;  %s1448_s17 = smov [#allocation3]  }
  0x12   : > { %s1386_s18 = sshll.u32 %s1448_s17, 4  ;;  %s1387_s18 = int_to_ptr.vmem [resolvable:$false] %s1386_s18 }
  0x13   : > { %p1384_p12 = pnand %p1382_p11, %p1370_p10  ;;  %s1388_s24 = scalar_lea.vmem %s1387_s18, 4096 }
  0x14   : > { %p1389_p0 = scmp.lt.s32.totalorder %s213_s13, %s1387_s18  ;;  %p1390_p1 = scmp.lt.s32.totalorder %s1388_s24, %s1381_s16 }
  0x15   : > { %p1385_p13 = pneg %p1384_p12 }
  0x16   : > { %p1391_p2 = por %p1390_p1, %p1389_p0 }
  0x18   : > { %p1392_p3 = pnand %p1391_p2, %p1385_p13 }
  0x1a   : > { %1395 = shalt.err (!%p1392_p3)
}
  0x1b   : > { %s1449_s26 = smov 128   ;;  %s1450_s27 = smov 8  }
  0x1c   : > { %1273 = dma.hbm_to_vmem [thread:$0]  (!%p1540_p9), %s211_s11, 2048, %s213_s13, %s199_s15, %s1449_s26, %s1449_s26, %s1450_s27  }
  0x1d   : > { %p1074_p4 = scmp.ge.s32.totalorder %s1446_s23, 1  ;;  %p220_p5 = scmp.lt.s32.totalorder %s1446_s23, 3 }
  0x1f   : > { %p221_p6 = pnand %p1074_p4, %p220_p5 }
  0x20   : > { %s226_s28 = sand.u32 (!%p221_p6), 1, %s1430_s19  }
  0x21   : > { %224 = sbr.rel (%p221_p6) target bundleno = 542 (0x21e), region = 40  ;;  %s1075_s6 = sshll.u32 (!%p221_p6), %s226_s28, 7 }
  0x22   : > { %s227_s7 = scalar_lea.sflag (!%p221_p6), [#allocation4], %s226_s28  ;;  %s1551_s8 = scalar_lea.vmem (!%p221_p6), [#allocation3], %s1075_s6 }
  0x26   : > { %1421 = dma.done.wait (%p1525_p7), %s227_s7, 2048  }
  0x27   : > { %1423 = vsyncadd (%p1525_p7), %s227_s7, 4294965248  ;;  %v1326_v0 = vld [vmem:[%s1766_s1 + $0x78] sm:$0xff]   ;;  %v1328_v2 = vld [vmem:[%s1766_s1 + $0x70] sm:$0xff]   ;;  %vm270_vm0 = vcmask 261120   ;;  %v1451_v32 = vmov 0.0   ;;  %s1076_s12 = sshll.u32 %s1438_s21, 4 }
  0x28   : > { %v1327_v1 = vld [vmem:[%s1766_s1 + $0x38] sm:$0xff]   ;;  %1158 = vmatprep.subr.bf16.mxu0 %v1326_v0  ;;  %1252 = vmatprep.subr.bf16.mxu1 %v1326_v0  ;;  %v1329_v3 = vld [vmem:[%s1766_s1 + $0x30] sm:$0xff]   ;;  %v1330_v4 = vld [vmem:[%s1766_s1 + $0x68] sm:$0xff]   ;;  %271 = vst.msk [vmem:[#allocation2] sm:$0xff] %vm270_vm0, %v1451_v32  ;;  %p260_p7 = scmp.lt.s32.totalorder %s1076_s12, 31 }
  0x29   : > { %1159 = vmatpush3.bf16.msra.mxu0 %v1327_v1  ;;  %1260 = vmatpush3.bf16.msra.mxu1 %v1327_v1  ;;  %v1331_v5 = vld [vmem:[%s1766_s1 + $0x28] sm:$0xff]   ;;  %v1332_v6 = vld [vmem:[%s1766_s1 + $0x60] sm:$0xff]   ;;  %v1334_v8 = vld [vmem:[%s1766_s1 + $0x58] sm:$0xff]   ;;  %272 = vst.msk [vmem:[#allocation2 + $0x8] sm:$0xff] %vm270_vm0, %v1451_v32 }
  0x2a   : > { %1160 = vmatprep.subr.bf16.mxu0 %v1328_v2  ;;  %1253 = vmatprep.subr.bf16.mxu1 %v1328_v2  ;;  %v1333_v7 = vld [vmem:[%s1766_s1 + $0x20] sm:$0xff]   ;;  %v1335_v9 = vld [vmem:[%s1766_s1 + $0x18] sm:$0xff]   ;;  %v1336_v10 = vld [vmem:[%s1766_s1 + $0x50] sm:$0xff]   ;;  %273 = vst.msk [vmem:[#allocation2 + $0x10] sm:$0xff] %vm270_vm0, %v1451_v32  ;;  %s1782_s12 = smov (!%p260_p7, %s1076_s12), 31 }
  0x2b   : > { %v1344_v11 = vld [vmem:[%s1551_s8 + $0x4] ss:$8 sps:$4 sm:$0xff]   ;;  %v1337_v12 = vld [vmem:[%s1766_s1 + $0x10] sm:$0xff]   ;;  %v1342_v18 = vld [vmem:[%s1551_s8] ss:$8 sps:$4 sm:$0xff]   ;;  %274 = vst.msk [vmem:[#allocation2 + $0x18] sm:$0xff] %vm270_vm0, %v1451_v32 }
  0x2c   : > { %564 = vmatprep.mubr.bf16.mxu0 %v1344_v11  ;;  %v1338_v13 = vld [vmem:[%s1766_s1 + $0x48] sm:$0xff]   ;;  %v1340_v16 = vld [vmem:[%s1766_s1 + $0x40] sm:$0xff]   ;;  %v1345_v19 = vld [vmem:[%s1551_s8 + $0x14] ss:$8 sps:$4 sm:$0xff]   ;;  %275 = vst.msk [vmem:[#allocation2 + $0x20] sm:$0xff] %vm270_vm0, %v1451_v32  ;;  %s1077_s15 = sshll.u32 %s1782_s12, 2 }
  0x2d   : > { %1161 = vmatpush3.bf16.msra.mxu0 %v1329_v3  ;;  %1261 = vmatpush3.bf16.msra.mxu1 %v1329_v3  ;;  %v1339_v14 = vld [vmem:[%s1766_s1 + $0x8] sm:$0xff]   ;;  %v1341_v17 = vld [vmem:[%s1766_s1] sm:$0xff]   ;;  %v1362_v21 = vld [vmem:[%s1551_s8 + $0x74] ss:$8 sps:$4 sm:$0xff]   ;;  %276 = vst.msk [vmem:[#allocation2 + $0x28] sm:$0xff] %vm270_vm0, %v1451_v32  ;;  %s1698_s17 = scalar_lea.vmem %s1770_s5, %s1077_s15 }
  0x2e   : > { %1162 = vmatprep.subr.bf16.mxu0 %v1330_v4  ;;  %1254 = vmatprep.subr.bf16.mxu1 %v1330_v4  ;;  %v1358_v15 = vld [vmem:[%s1551_s8 + $0x64] ss:$8 sps:$4 sm:$0xff]   ;;  %v1356_v20 = vld [vmem:[%s1551_s8 + $0x60] ss:$8 sps:$4 sm:$0xff]   ;;  %v1347_v22 = vld [vmem:[%s1551_s8 + $0x10] ss:$8 sps:$4 sm:$0xff]  }
  0x2f   : > { %612 = vmatprep.mubr.bf16.mxu1 %v1358_v15  ;;  %v1348_v23 = vld [vmem:[%s1551_s8 + $0x24] ss:$8 sps:$4 sm:$0xff]   ;;  %v1365_v24 = vld [vmem:[%s1551_s8 + $0x70] ss:$8 sps:$4 sm:$0xff]   ;;  %v1350_v25 = vld [vmem:[%s1551_s8 + $0x20] ss:$8 sps:$4 sm:$0xff]  }
  0x30   : > { %v1351_v26 = vld [vmem:[%s1551_s8 + $0x34] ss:$8 sps:$4 sm:$0xff]   ;;  %v1353_v27 = vld [vmem:[%s1551_s8 + $0x30] ss:$8 sps:$4 sm:$0xff]   ;;  %v1354_v28 = vld [vmem:[%s1551_s8 + $0x44] ss:$8 sps:$4 sm:$0xff]  }
  0x31   : > { %1163 = vmatpush3.bf16.msra.mxu0 %v1331_v5  ;;  %1262 = vmatpush3.bf16.msra.mxu1 %v1331_v5  ;;  %v1359_v29 = vld [vmem:[%s1551_s8 + $0x40] ss:$8 sps:$4 sm:$0xff]   ;;  %v1360_v30 = vld [vmem:[%s1551_s8 + $0x54] ss:$8 sps:$4 sm:$0xff]   ;;  %v1364_v31 = vld [vmem:[%s1551_s8 + $0x50] ss:$8 sps:$4 sm:$0xff]  }
  0x32   : > { %1164 = vmatprep.subr.bf16.mxu0 %v1332_v6  ;;  %1255 = vmatprep.subr.bf16.mxu1 %v1332_v6  ;;  %277 = vst.msk [vmem:[#allocation2 + $0x30] sm:$0xff] %vm270_vm0, %v1451_v32  ;;  %278 = vst.msk [vmem:[#allocation2 + $0x38] sm:$0xff] %vm270_vm0, %v1451_v32  ;;  %v1366_v33 = vld [vmem:[%s1768_s3 + $0x8] sm:$0xff]   ;;  %v1367_v34 = vld [vmem:[%s1768_s3] sm:$0xff]  }
  0x33   : > { %279 = vst.msk [vmem:[#allocation2 + $0x40] sm:$0xff] %vm270_vm0, %v1451_v32  ;;  %280 = vst.msk [vmem:[#allocation2 + $0x48] sm:$0xff] %vm270_vm0, %v1451_v32  ;;  %v324_v37 = vld [vmem:[#allocation2] sm:$0xff]  ;;  %v325_v46 = vld [vmem:[#allocation2 + $0x8] sm:$0xff] }
  0x34   : > { %281 = vst.msk [vmem:[#allocation2 + $0x50] sm:$0xff] %vm270_vm0, %v1451_v32  ;;  %282 = vst.msk [vmem:[#allocation2 + $0x58] sm:$0xff] %vm270_vm0, %v1451_v32  ;;  %v326_v56 = vld [vmem:[#allocation2 + $0x10] sm:$0xff]  ;;  %v1649_v63 = vld [vmem:[%s1767_s2] ss:$0 sm:$0xff] }
  0x35   : > { %1165 = vmatpush3.bf16.msra.mxu0 %v1333_v7  ;;  %1263 = vmatpush3.bf16.msra.mxu1 %v1333_v7  ;;  %283 = vst.msk [vmem:[#allocation2 + $0x60] sm:$0xff] %vm270_vm0, %v1451_v32  ;;  %284 = vst.msk [vmem:[#allocation2 + $0x68] sm:$0xff] %vm270_vm0, %v1451_v32  ;;  %v327_v3 = vld [vmem:[#allocation2 + $0x18] sm:$0xff] }
  0x36   : > { %1166 = vmatprep.subr.bf16.mxu0 %v1334_v8  ;;  %1256 = vmatprep.subr.bf16.mxu1 %v1334_v8  ;;  %285 = vst.msk [vmem:[#allocation2 + $0x70] sm:$0xff] %vm270_vm0, %v1451_v32  ;;  %286 = vst.msk [vmem:[#allocation2 + $0x78] sm:$0xff] %vm270_vm0, %v1451_v32 }
  0x39   : > { %1167 = vmatpush3.bf16.msra.mxu0 %v1335_v9  ;;  %1264 = vmatpush3.bf16.msra.mxu1 %v1335_v9 }
  0x3a   : > { %1168 = vmatprep.subr.bf16.mxu0 %v1336_v10  ;;  %1257 = vmatprep.subr.bf16.mxu1 %v1336_v10 }
  0x3c   : > { %v336_v40 = vld [vmem:[#allocation2 + $0x60] sm:$0xff]  ;;  %v337_v50 = vld [vmem:[#allocation2 + $0x68] sm:$0xff] }
  0x3d   : > { %1169 = vmatpush3.bf16.msra.mxu0 %v1337_v12  ;;  %1265 = vmatpush3.bf16.msra.mxu1 %v1337_v12  ;;  %v338_v60 = vld [vmem:[#allocation2 + $0x70] sm:$0xff]  ;;  %v339_v9 = vld [vmem:[#allocation2 + $0x78] sm:$0xff] }
  0x3e   : > { %1170 = vmatprep.subr.bf16.mxu0 %v1338_v13  ;;  %1258 = vmatprep.subr.bf16.mxu1 %v1338_v13 }
  0x41   : > { %1171 = vmatpush3.bf16.msra.mxu0 %v1339_v14  ;;  %1266 = vmatpush3.bf16.msra.mxu1 %v1339_v14  ;;  %v328_v14 = vld [vmem:[#allocation2 + $0x20] sm:$0xff] }
  0x42   : > { %1172 = vmatprep.subr.bf16.mxu0 %v1340_v16  ;;  %1259 = vmatprep.subr.bf16.mxu1 %v1340_v16 }
  0x45   : > { %1173 = vmatpush3.bf16.msra.mxu0 %v1341_v17  ;;  %1267 = vmatpush3.bf16.msra.mxu1 %v1341_v17 }
  0x46   : > { %1232 = vmatprep.subr.bf16.mxu1 %v1366_v33 }
  0x48   : > { %565 = vmatmul.mubr.bf16.vlgmr.msra.gmra.mxu0 %v1342_v18  ;;  %613 = vmatmul.mubr.bf16.vlgmr.msra.gmra.mxu1 %v1356_v20 }
  0x49   : > { %572 = vmatprep.mubr.bf16.mxu0 %v1345_v19  ;;  %620 = vmatprep.mubr.bf16.mxu1 %v1362_v21 }
  0x4a   : > { %1233 = vmatpush3.bf16.msra.mxu1 %v1366_v33 }
  0x4b   : > { %1234 = vmatprep.subr.bf16.mxu1 %v1367_v34 }
  0x4e   : > { %1235 = vmatpush3.bf16.msra.mxu1 %v1367_v34  ;;  %v330_v34 = vld [vmem:[#allocation2 + $0x30] sm:$0xff] }
  0x50   : > { %573 = vmatmul.mubr.bf16.gmra.mxu0 %v1347_v22  ;;  %621 = vmatmul.mubr.bf16.gmra.mxu1 %v1365_v24  ;;  %v329_v24 = vld [vmem:[#allocation2 + $0x28] sm:$0xff] }
  0x51   : > { %580 = vmatprep.mubr.bf16.mxu0 %v1348_v23 }
  0x58   : > { %581 = vmatmul.mubr.bf16.gmra.mxu0 %v1350_v25 }
  0x59   : > { %588 = vmatprep.mubr.bf16.mxu0 %v1351_v26 }
  0x60   : > { %589 = vmatmul.mubr.bf16.gmra.mxu0 %v1353_v27 }
  0x61   : > { %596 = vmatprep.mubr.bf16.mxu0 %v1354_v28 }
  0x68   : > { %597 = vmatmul.mubr.bf16.gmra.mxu0 %v1359_v29 }
  0x69   : > { %604 = vmatprep.mubr.bf16.mxu0 %v1360_v30 }
  0x70   : > { %605 = vmatmul.mubr.bf16.gmra.mxu0 %v1364_v31 }
 0x108   : > { %v1174_v35 = vpop.f32.mrf.mxu0  ;;  %v1210_v36 = vpop.f32.mrf.mxu1 }
 0x10a   : > { %v1175_v38 = vpop.f32.mrf.mxu0  ;;  %v1211_v41 = vpop.f32.mrf.mxu1 }
 0x10b   : > { %v1176_v39 = vadd.f32 %v1175_v38, %v1174_v35  ;;  %v1212_v43 = vadd.f32 %v1211_v41, %v1210_v36 }
 0x10c   : > { %v1177_v42 = vpop.f32.mrf.mxu0  ;;  %v1213_v45 = vpop.f32.mrf.mxu1 }
 0x10d   : > { %v629_v44 = vadd.f32 %v1176_v39, %v324_v37  ;;  %v641_v48 = vadd.f32 %v1212_v43, %v336_v40  ;;  %v331_v43 = vld [vmem:[#allocation2 + $0x38] sm:$0xff] }
 0x10e   : > { %v1178_v47 = vpop.f32.mrf.mxu0  ;;  %v1214_v51 = vpop.f32.mrf.mxu1 }
 0x10f   : > { %646 = vst.msk [vmem:[#allocation2] sm:$0xff] %vm270_vm0, %v629_v44  ;;  %v1179_v49 = vadd.f32 %v1178_v47, %v1177_v42  ;;  %658 = vst.msk [vmem:[#allocation2 + $0x60] sm:$0xff] %vm270_vm0, %v641_v48  ;;  %v1215_v53 = vadd.f32 %v1214_v51, %v1213_v45 }
 0x110   : > { %v1180_v52 = vpop.f32.mrf.mxu0  ;;  %v1216_v55 = vpop.f32.mrf.mxu1 }
 0x111   : > { %v630_v54 = vadd.f32 %v1179_v49, %v325_v46  ;;  %v642_v58 = vadd.f32 %v1215_v53, %v337_v50  ;;  %v332_v53 = vld [vmem:[#allocation2 + $0x40] sm:$0xff] }
 0x112   : > { %v1181_v57 = vpop.f32.mrf.mxu0  ;;  %v1217_v61 = vpop.f32.mrf.mxu1 }
 0x113   : > { %647 = vst.msk [vmem:[#allocation2 + $0x8] sm:$0xff] %vm270_vm0, %v630_v54  ;;  %v1182_v59 = vadd.f32 %v1181_v57, %v1180_v52  ;;  %659 = vst.msk [vmem:[#allocation2 + $0x68] sm:$0xff] %vm270_vm0, %v642_v58  ;;  %v1218_v0 = vadd.f32 %v1217_v61, %v1216_v55 }
 0x114   : > { %v1183_v62 = vpop.f32.mrf.mxu0  ;;  %v1219_v2 = vpop.f32.mrf.mxu1 }
 0x115   : > { %v631_v1 = vadd.f32 %v1182_v59, %v326_v56  ;;  %v643_v6 = vadd.f32 %v1218_v0, %v338_v60 }
 0x116   : > { %v1184_v4 = vpop.f32.mrf.mxu0  ;;  %v665_v5 = vld [vmem:[#allocation2] sm:$0xff]  ;;  %v1220_v10 = vpop.f32.mrf.mxu1 }
 0x117   : > { %648 = vst.msk [vmem:[#allocation2 + $0x10] sm:$0xff] %vm270_vm0, %v631_v1  ;;  %v1185_v7 = vadd.f32 %v1184_v4, %v1183_v62  ;;  %v688_v8 = vadd.f32 %v1649_v63, %v665_v5  ;;  %660 = vst.msk [vmem:[#allocation2 + $0x70] sm:$0xff] %vm270_vm0, %v643_v6  ;;  %v1221_v12 = vadd.f32 %v1220_v10, %v1219_v2  ;;  %v333_v62 = vld [vmem:[#allocation2 + $0x48] sm:$0xff] }
 0x118   : > { %v1186_v11 = vpop.f32.mrf.mxu0 }
 0x119   : > { %v632_v13 = vadd.f32 %v1185_v7, %v327_v3  ;;  %v644_v17 = vadd.f32 %v1221_v12, %v339_v9  ;;  %v720_v20 = vmul.f32 0.01, %v688_v8  ;;  %vm704_vm1 = vcmp.gt.f32.partialorder %v688_v8, 0.0  ;;  %v334_v9 = vld [vmem:[#allocation2 + $0x50] sm:$0xff] }
 0x11a   : > { %v1187_v15 = vpop.f32.mrf.mxu0  ;;  %v666_v16 = vld [vmem:[#allocation2 + $0x8] sm:$0xff] }
 0x11b   : > { %649 = vst.msk [vmem:[#allocation2 + $0x18] sm:$0xff] %vm270_vm0, %v632_v13  ;;  %v1188_v18 = vadd.f32 %v1187_v15, %v1186_v11  ;;  %v689_v19 = vadd.f32 %v1649_v63, %v666_v16  ;;  %661 = vst.msk [vmem:[#allocation2 + $0x78] sm:$0xff] %vm270_vm0, %v644_v17  ;;  %v736_v28 = vsel %vm704_vm1, %v688_v8, %v720_v20 }
 0x11c   : > { %v1189_v21 = vpop.f32.mrf.mxu0 }
 0x11d   : > { %v633_v22 = vadd.f32 %v1188_v18, %v328_v14  ;;  %vm705_vm2 = vcmp.gt.f32.partialorder %v689_v19, 0.0  ;;  %v721_v23 = vmul.f32 0.01, %v689_v19  ;;  %v335_v18 = vld [vmem:[#allocation2 + $0x58] sm:$0xff] }
 0x11e   : > { %v1190_v25 = vpop.f32.mrf.mxu0  ;;  %v667_v26 = vld [vmem:[#allocation2 + $0x10] sm:$0xff] }
 0x11f   : > { %650 = vst.msk [vmem:[#allocation2 + $0x20] sm:$0xff] %vm270_vm0, %v633_v22  ;;  %v1191_v27 = vadd.f32 %v1190_v25, %v1189_v21  ;;  %v737_v29 = vsel %vm705_vm2, %v689_v19, %v721_v23  ;;  %v690_v30 = vadd.f32 %v1649_v63, %v667_v26 }
 0x120   : > { %v1192_v31 = vpop.f32.mrf.mxu0  ;;  %v752_v32 = vpack.c.bf16 %v737_v29, %v736_v28  ;;  %v677_v28 = vld [vmem:[#allocation2 + $0x60] sm:$0xff] }
 0x121   : > { %v634_v33 = vadd.f32 %v1191_v27, %v329_v24  ;;  %v722_v39 = vmul.f32 0.01, %v690_v30  ;;  %vm706_vm3 = vcmp.gt.f32.partialorder %v690_v30, 0.0 }
 0x122   : > { %v1193_v35 = vpop.f32.mrf.mxu0  ;;  %1236 = vmatprep.mubr.msk.bf16.mxu1 %vm270_vm0, %v752_v32  ;;  %v668_v36 = vld [vmem:[#allocation2 + $0x18] sm:$0xff] }
 0x123   : > { %651 = vst.msk [vmem:[#allocation2 + $0x28] sm:$0xff] %vm270_vm0, %v634_v33  ;;  %v1194_v37 = vadd.f32 %v1193_v35, %v1192_v31  ;;  %v691_v38 = vadd.f32 %v1649_v63, %v668_v36  ;;  %v738_v47 = vsel %vm706_vm3, %v690_v30, %v722_v39  ;;  %v678_v31 = vld [vmem:[#allocation2 + $0x68] sm:$0xff]  ;;  %v700_v33 = vadd.f32 %v1649_v63, %v677_v28 }
 0x124   : > { %v1195_v40 = vpop.f32.mrf.mxu0  ;;  %v701_v35 = vadd.f32 %v1649_v63, %v678_v31 }
 0x125   : > { %v635_v41 = vadd.f32 %v1194_v37, %v330_v34  ;;  %vm707_vm4 = vcmp.gt.f32.partialorder %v691_v38, 0.0  ;;  %v723_v42 = vmul.f32 0.01, %v691_v38  ;;  %vm716_vm11 = vcmp.gt.f32.partialorder %v700_v33, 0.0 }
 0x126   : > { %v1196_v44 = vpop.f32.mrf.mxu0  ;;  %v669_v45 = vld [vmem:[#allocation2 + $0x20] sm:$0xff]  ;;  %vm717_vm12 = vcmp.gt.f32.partialorder %v701_v35, 0.0 }
 0x127   : > { %652 = vst.msk [vmem:[#allocation2 + $0x30] sm:$0xff] %vm270_vm0, %v635_v41  ;;  %v1197_v46 = vadd.f32 %v1196_v44, %v1195_v40  ;;  %v739_v48 = vsel %vm707_vm4, %v691_v38, %v723_v42  ;;  %v692_v49 = vadd.f32 %v1649_v63, %v669_v45  ;;  %v732_v40 = vmul.f32 0.01, %v700_v33  ;;  %v680_v44 = vld [vmem:[#allocation2 + $0x78] sm:$0xff] }
 0x128   : > { %v1198_v50 = vpop.f32.mrf.mxu0  ;;  %v753_v51 = vpack.c.bf16 %v739_v48, %v738_v47  ;;  %v733_v42 = vmul.f32 0.01, %v701_v35 }
 0x129   : > { %v636_v52 = vadd.f32 %v1197_v46, %v331_v43  ;;  %v724_v58 = vmul.f32 0.01, %v692_v49  ;;  %vm708_vm5 = vcmp.gt.f32.partialorder %v692_v49, 0.0  ;;  %v679_v43 = vld [vmem:[#allocation2 + $0x70] sm:$0xff] }
 0x12a   : > { %v1199_v54 = vpop.f32.mrf.mxu0  ;;  %1237 = vmatmul.mubr.msk.bf16.vlgmr.msra.gmra.mxu1 %vm270_vm0, %v753_v51  ;;  %v670_v55 = vld [vmem:[#allocation2 + $0x28] sm:$0xff]  ;;  %v702_v48 = vadd.f32 %v1649_v63, %v679_v43  ;;  %v749_v51 = vsel %vm717_vm12, %v701_v35, %v733_v42 }
 0x12b   : > { %653 = vst.msk [vmem:[#allocation2 + $0x38] sm:$0xff] %vm270_vm0, %v636_v52  ;;  %v1200_v56 = vadd.f32 %v1199_v54, %v1198_v50  ;;  %v693_v57 = vadd.f32 %v1649_v63, %v670_v55  ;;  %v740_v3 = vsel %vm708_vm5, %v692_v49, %v724_v58  ;;  %v703_v49 = vadd.f32 %v1649_v63, %v680_v44 }
 0x12c   : > { %v1201_v59 = vpop.f32.mrf.mxu0  ;;  %v748_v50 = vsel %vm716_vm11, %v700_v33, %v732_v40  ;;  %vm718_vm15 = vcmp.gt.f32.partialorder %v702_v48, 0.0 }
 0x12d   : > { %v637_v60 = vadd.f32 %v1200_v56, %v332_v53  ;;  %vm709_vm6 = vcmp.gt.f32.partialorder %v693_v57, 0.0  ;;  %v725_v61 = vmul.f32 0.01, %v693_v57  ;;  %v758_v55 = vpack.c.bf16 %v749_v51, %v748_v50 }
 0x12e   : > { %v1202_v0 = vpop.f32.mrf.mxu0  ;;  %v671_v1 = vld [vmem:[#allocation2 + $0x30] sm:$0xff]  ;;  %v734_v56 = vmul.f32 0.01, %v702_v48  ;;  %vm719_vm1 = vcmp.gt.f32.partialorder %v703_v49, 0.0 }
 0x12f   : > { %654 = vst.msk [vmem:[#allocation2 + $0x40] sm:$0xff] %vm270_vm0, %v637_v60  ;;  %v1203_v2 = vadd.f32 %v1202_v0, %v1201_v59  ;;  %v741_v4 = vsel %vm709_vm6, %v693_v57, %v725_v61  ;;  %v694_v5 = vadd.f32 %v1649_v63, %v671_v1  ;;  %v735_v57 = vmul.f32 0.01, %v703_v49 }
 0x130   : > { %v1204_v6 = vpop.f32.mrf.mxu0  ;;  %v754_v7 = vpack.c.bf16 %v741_v4, %v740_v3  ;;  %v750_v58 = vsel %vm718_vm15, %v702_v48, %v734_v56 }
 0x131   : > { %v638_v8 = vadd.f32 %v1203_v2, %v333_v62  ;;  %v726_v14 = vmul.f32 0.01, %v694_v5  ;;  %vm710_vm7 = vcmp.gt.f32.partialorder %v694_v5, 0.0  ;;  %v751_v59 = vsel %vm719_vm1, %v703_v49, %v735_v57 }
 0x132   : > { %v1205_v10 = vpop.f32.mrf.mxu0  ;;  %1240 = vmatprep.mubr.msk.bf16.mxu1 %vm270_vm0, %v754_v7  ;;  %v672_v11 = vld [vmem:[#allocation2 + $0x38] sm:$0xff]  ;;  %v759_v60 = vpack.c.bf16 %v751_v59, %v750_v58 }
 0x133   : > { %655 = vst.msk [vmem:[#allocation2 + $0x48] sm:$0xff] %vm270_vm0, %v638_v8  ;;  %v1206_v12 = vadd.f32 %v1205_v10, %v1204_v6  ;;  %v695_v13 = vadd.f32 %v1649_v63, %v672_v11  ;;  %v742_v22 = vsel %vm710_vm7, %v694_v5, %v726_v14 }
 0x134   : > { %v1207_v15 = vpop.f32.mrf.mxu0 }
 0x135   : > { %v639_v16 = vadd.f32 %v1206_v12, %v334_v9  ;;  %vm711_vm8 = vcmp.gt.f32.partialorder %v695_v13, 0.0  ;;  %v727_v17 = vmul.f32 0.01, %v695_v13 }
 0x136   : > { %v1208_v19 = vpop.f32.mrf.mxu0  ;;  %v673_v20 = vld [vmem:[#allocation2 + $0x40] sm:$0xff] }
 0x137   : > { %656 = vst.msk [vmem:[#allocation2 + $0x50] sm:$0xff] %vm270_vm0, %v639_v16  ;;  %v1209_v21 = vadd.f32 %v1208_v19, %v1207_v15  ;;  %v743_v23 = vsel %vm711_vm8, %v695_v13, %v727_v17  ;;  %v696_v24 = vadd.f32 %v1649_v63, %v673_v20 }
 0x138   : > { %v755_v25 = vpack.c.bf16 %v743_v23, %v742_v22 }
 0x139   : > { %v640_v26 = vadd.f32 %v1209_v21, %v335_v18  ;;  %v728_v30 = vmul.f32 0.01, %v696_v24  ;;  %vm712_vm9 = vcmp.gt.f32.partialorder %v696_v24, 0.0 }
 0x13a   : > { %1241 = vmatmul.mubr.msk.bf16.gmra.mxu1 %vm270_vm0, %v755_v25  ;;  %v674_v27 = vld [vmem:[#allocation2 + $0x48] sm:$0xff] }
 0x13b   : > { %657 = vst.msk [vmem:[#allocation2 + $0x58] sm:$0xff] %vm270_vm0, %v640_v26  ;;  %v697_v29 = vadd.f32 %v1649_v63, %v674_v27  ;;  %v744_v36 = vsel %vm712_vm9, %v696_v24, %v728_v30 }
 0x13d   : > { %vm713_vm10 = vcmp.gt.f32.partialorder %v697_v29, 0.0  ;;  %v729_v32 = vmul.f32 0.01, %v697_v29 }
 0x13e   : > { %v675_v34 = vld [vmem:[#allocation2 + $0x50] sm:$0xff] }
 0x13f   : > { %v745_v37 = vsel %vm713_vm10, %v697_v29, %v729_v32  ;;  %v698_v38 = vadd.f32 %v1649_v63, %v675_v34 }
 0x140   : > { %v756_v39 = vpack.c.bf16 %v745_v37, %v744_v36 }
 0x141   : > { %v730_v46 = vmul.f32 0.01, %v698_v38  ;;  %vm714_vm13 = vcmp.gt.f32.partialorder %v698_v38, 0.0 }
 0x142   : > { %1244 = vmatprep.mubr.msk.bf16.mxu1 %vm270_vm0, %v756_v39  ;;  %v676_v41 = vld [vmem:[#allocation2 + $0x58] sm:$0xff] }
 0x143   : > { %v699_v45 = vadd.f32 %v1649_v63, %v676_v41  ;;  %v746_v52 = vsel %vm714_vm13, %v698_v38, %v730_v46  ;;  %v1692_v63 = vld [vmem:[%s1769_s4] ss:$0 sm:$0xff] }
 0x145   : > { %vm715_vm14 = vcmp.gt.f32.partialorder %v699_v45, 0.0  ;;  %v731_v47 = vmul.f32 0.01, %v699_v45 }
 0x147   : > { %v747_v53 = vsel %vm715_vm14, %v699_v45, %v731_v47 }
 0x148   : > { %v757_v54 = vpack.c.bf16 %v747_v53, %v746_v52 }
 0x14a   : > { %1245 = vmatmul.mubr.msk.bf16.gmra.mxu1 %vm270_vm0, %v757_v54 }
 0x14b   : > { %1248 = vmatprep.mubr.msk.bf16.mxu1 %vm270_vm0, %v758_v55 }
 0x152   : > { %1249 = vmatmul.mubr.msk.bf16.gmra.mxu1 %vm270_vm0, %v759_v60  ;;  %vm968_vm0 = vcmask 125952  }
 0x1ea   : > { %v1238_v61 = vpop.f32.mrf.mxu1 }
 0x1eb   : > { %v850_v62 = vadd.f32 %v1238_v61, %v1692_v63 }
 0x1ec   : > { %v841_v0 = vpop.f32.mrf.mxu1 }
 0x1ed   : > { %v1144_v1 = vpack.c.bf16 %v850_v62, %v850_v62  ;;  %v842_v2 = vadd.f32 %v1692_v63, %v841_v0 }
 0x1ee   : > { %v1239_v3 = vpop.f32.mrf.mxu1 }
 0x1ef   : > { %971 = vst.msk [vmem:[%s1698_s17 + $0x8] sm:$0xf] %vm968_vm0, %v1144_v1  ;;  %v1142_v4 = vpack.c.bf16 %v842_v2, %v842_v2  ;;  %v853_v5 = vadd.f32 %v1239_v3, %v1692_v63 }
 0x1f0   : > { %v844_v6 = vpop.f32.mrf.mxu1 }
 0x1f1   : > { %969 = vst.msk [vmem:[%s1698_s17] sm:$0xf] %vm968_vm0, %v1142_v4  ;;  %v1145_v7 = vpack.c.bf16 %v853_v5, %v853_v5  ;;  %v845_v8 = vadd.f32 %v1692_v63, %v844_v6 }
 0x1f3   : > { %972 = vst.msk [vmem:[%s1698_s17 + $0xc] sm:$0xf] %vm968_vm0, %v1145_v7  ;;  %v1143_v9 = vpack.c.bf16 %v845_v8, %v845_v8 }
 0x1f5   : > { %970 = vst.msk [vmem:[%s1698_s17 + $0x4] sm:$0xf] %vm968_vm0, %v1143_v9 }
 0x1fa   : > { %v1242_v10 = vpop.f32.mrf.mxu1 }
 0x1fb   : > { %v866_v11 = vadd.f32 %v1242_v10, %v1692_v63 }
 0x1fc   : > { %v857_v12 = vpop.f32.mrf.mxu1 }
 0x1fd   : > { %v1148_v13 = vpack.c.bf16 %v866_v11, %v866_v11  ;;  %v858_v14 = vadd.f32 %v1692_v63, %v857_v12 }
 0x1fe   : > { %v1243_v15 = vpop.f32.mrf.mxu1 }
 0x1ff   : > { %975 = vst.msk [vmem:[%s1698_s17 + $0x18] sm:$0xf] %vm968_vm0, %v1148_v13  ;;  %v1146_v16 = vpack.c.bf16 %v858_v14, %v858_v14  ;;  %v869_v17 = vadd.f32 %v1243_v15, %v1692_v63 }
 0x200   : > { %v860_v18 = vpop.f32.mrf.mxu1 }
 0x201   : > { %973 = vst.msk [vmem:[%s1698_s17 + $0x10] sm:$0xf] %vm968_vm0, %v1146_v16  ;;  %v1149_v19 = vpack.c.bf16 %v869_v17, %v869_v17  ;;  %v861_v20 = vadd.f32 %v1692_v63, %v860_v18 }
 0x203   : > { %976 = vst.msk [vmem:[%s1698_s17 + $0x1c] sm:$0xf] %vm968_vm0, %v1149_v19  ;;  %v1147_v21 = vpack.c.bf16 %v861_v20, %v861_v20 }
 0x205   : > { %974 = vst.msk [vmem:[%s1698_s17 + $0x14] sm:$0xf] %vm968_vm0, %v1147_v21 }
 0x20a   : > { %v1246_v22 = vpop.f32.mrf.mxu1 }
 0x20b   : > { %v882_v23 = vadd.f32 %v1246_v22, %v1692_v63 }
 0x20c   : > { %v873_v24 = vpop.f32.mrf.mxu1 }
 0x20d   : > { %v1152_v25 = vpack.c.bf16 %v882_v23, %v882_v23  ;;  %v874_v26 = vadd.f32 %v1692_v63, %v873_v24 }
 0x20e   : > { %v1247_v27 = vpop.f32.mrf.mxu1 }
 0x20f   : > { %979 = vst.msk [vmem:[%s1698_s17 + $0x28] sm:$0xf] %vm968_vm0, %v1152_v25  ;;  %v1150_v28 = vpack.c.bf16 %v874_v26, %v874_v26  ;;  %v885_v29 = vadd.f32 %v1247_v27, %v1692_v63 }
 0x210   : > { %v876_v30 = vpop.f32.mrf.mxu1 }
 0x211   : > { %977 = vst.msk [vmem:[%s1698_s17 + $0x20] sm:$0xf] %vm968_vm0, %v1150_v28  ;;  %v1153_v31 = vpack.c.bf16 %v885_v29, %v885_v29  ;;  %v877_v32 = vadd.f32 %v1692_v63, %v876_v30 }
 0x212   : > { %v1250_v33 = vpop.f32.mrf.mxu1 }
 0x213   : > { %980 = vst.msk [vmem:[%s1698_s17 + $0x2c] sm:$0xf] %vm968_vm0, %v1153_v31  ;;  %v1151_v34 = vpack.c.bf16 %v877_v32, %v877_v32  ;;  %v898_v35 = vadd.f32 %v1250_v33, %v1692_v63 }
 0x214   : > { %v889_v36 = vpop.f32.mrf.mxu1 }
 0x215   : > { %978 = vst.msk [vmem:[%s1698_s17 + $0x24] sm:$0xf] %vm968_vm0, %v1151_v34  ;;  %v1156_v37 = vpack.c.bf16 %v898_v35, %v898_v35  ;;  %v890_v38 = vadd.f32 %v1692_v63, %v889_v36 }
 0x216   : > { %v1251_v39 = vpop.f32.mrf.mxu1 }
 0x217   : > { %983 = vst.msk [vmem:[%s1698_s17 + $0x38] sm:$0xf] %vm968_vm0, %v1156_v37  ;;  %v1154_v40 = vpack.c.bf16 %v890_v38, %v890_v38  ;;  %v901_v41 = vadd.f32 %v1251_v39, %v1692_v63 }
 0x218   : > { %v892_v42 = vpop.f32.mrf.mxu1 }
 0x219   : > { %981 = vst.msk [vmem:[%s1698_s17 + $0x30] sm:$0xf] %vm968_vm0, %v1154_v40  ;;  %v1157_v43 = vpack.c.bf16 %v901_v41, %v901_v41  ;;  %v893_v44 = vadd.f32 %v1692_v63, %v892_v42 }
 0x21b   : > { %984 = vst.msk [vmem:[%s1698_s17 + $0x3c] sm:$0xf] %vm968_vm0, %v1157_v43  ;;  %v1155_v45 = vpack.c.bf16 %v893_v44, %v893_v44 }
 0x21d   : > { %982 = vst.msk [vmem:[%s1698_s17 + $0x34] sm:$0xf] %vm968_vm0, %v1155_v45 }
 0x21e PF: > { %s18_s23 = sadd.s32 1, %s1446_s23   ;;  %s1774_s18 = smov %s1430_s19 }
 0x21f   : > { %p15_p8 = scmp.ge.s32.totalorder %s18_s23, 4   ;;  %s1775_s19 = smov %s1434_s20 }
 0x220   : > { %s1776_s20 = smov %s1531_s30  ;;  %s1777_s21 = smov %s1442_s22 }
 0x221   : > { %s1778_s22 = smov %s1780_s25  ;;  %17 = sbr.rel (!%p15_p8) target bundleno = 4 (0x4), region = 89 }
 0x226   :  { %1007 = vsyncpa [#allocation4], 1 }
 0x227   :  { %1009 = vsyncpa [#allocation4 + $0x1], 1 }

</bundles_post_ra>
